<compile_context>
chip_gen: v5e
topology: v5e:2x2
jax: 0.10.0
libtpu: 0.0.40
codegen_flags: <defaults>
</compile_context>

<pallas_src>
import jax
import jax.numpy as jnp
from jax.experimental import pallas as pl
from jax.experimental.pallas import tpu as pltpu


def _round_up(x: int, m: int) -> int:
    return (x + m - 1) // m * m


# --------------------------------------------------------------------------
# Resident-W path: W fits in VMEM -> load it once (constant index_map), stream
# x / out once.  One grid step produces a full (tm, Hp) output row-block.
# --------------------------------------------------------------------------
def _resident_kernel(x_ref, w_ref, b_ref, o_ref):
    # x_ref: (tm, Hp)   w_ref: (Hp, Hp)   b_ref: (1, Hp)   o_ref: (tm, Hp)
    acc = x_ref[...].astype(jnp.float32) + b_ref[...].astype(jnp.float32)
    acc = acc + jnp.dot(x_ref[...], w_ref[...],
                        preferred_element_type=jnp.float32)
    o_ref[...] = acc.astype(o_ref.dtype)


# --------------------------------------------------------------------------
# Streaming path: 3-D grid (M, N, K), K innermost / "arbitrary".
# --------------------------------------------------------------------------
def _streaming_accumulate(x_ref, w_ref, b_ref, acc_ref):
    # x_ref: (tm, th)   w_ref: (th, th)   b_ref: (1, th)   acc_ref: (tm, th) f32
    j = pl.program_id(1)
    k = pl.program_id(2)

    @pl.when(k == 0)
    def _():
        # Bias folded into the accumulator init — added exactly once.
        acc_ref[...] = jnp.broadcast_to(
            b_ref[...].astype(jnp.float32), acc_ref.shape)

    @pl.when(k == j)
    def _():
        # tk == tn, so the LHS tile at k == j IS the residual tile: fold +x
        # here instead of streaming x a second time.
        acc_ref[...] += x_ref[...].astype(jnp.float32)

    acc_ref[...] += jnp.dot(x_ref[...], w_ref[...],
                            preferred_element_type=jnp.float32)


def _streaming_kernel_f32(x_ref, w_ref, b_ref, o_ref):
    # f32 output: accumulate directly into the resident output block (its
    # block index ignores k), no scratch needed.
    _streaming_accumulate(x_ref, w_ref, b_ref, o_ref)


def _streaming_kernel(x_ref, w_ref, b_ref, o_ref, acc_ref):
    # Low-precision output: f32 scratch accumulator, cast on the last K step.
    _streaming_accumulate(x_ref, w_ref, b_ref, acc_ref)

    @pl.when(pl.program_id(2) == pl.num_programs(2) - 1)
    def _():
        o_ref[...] = acc_ref[...].astype(o_ref.dtype)


# --------------------------------------------------------------------------
# Wrapper
# --------------------------------------------------------------------------
def residual_linear(x, w, b, *, tm_max=512, th_max=512, use_bf16=True,
                    w_resident="auto"):
    """Residual(Linear): (x @ w + b) + x, fused in a single Pallas kernel."""
    B, S, H = x.shape
    assert w.shape == (H, H) and b.shape == (H,)
    M = B * S
    out_dtype = x.dtype

    # MXU operand dtype (bf16 with f32 accumulation by default).
    mxu_dtype = jnp.bfloat16 if use_bf16 else x.dtype
    lhs_item = jnp.dtype(mxu_dtype).itemsize
    out_item = jnp.dtype(out_dtype).itemsize
    sublane = {4: 8, 2: 16, 1: 32}[lhs_item]

    x2 = x.reshape(M, H).astype(mxu_dtype)
    wm = w.astype(mxu_dtype)
    bf = b.astype(jnp.float32)

    # Lane-dense, packing-aligned tiles; one `th` serves both N and K so a
    # single padded hidden dim works (required for the k == j residual fold).
    tm = min(tm_max, _round_up(M, sublane))
    th = min(th_max, _round_up(H, 128))
    Mp = _round_up(M, tm)
    Hp = _round_up(H, th)

    # Zero padding is inert: padded K rows/cols of W contribute 0, padded
    # bias/residual entries are 0, padded M/N rows/cols are sliced off below.
    if (Mp, Hp) != (M, H):
        x2 = jnp.pad(x2, ((0, Mp - M), (0, Hp - H)))
    # TODO(synk): hoist the parameter pad/cast (wp, bp) to module init so it is
    # not re-materialised (extra HBM traffic) on every forward call.
    wp = jnp.pad(wm, ((0, Hp - H), (0, Hp - H))) if Hp != H else wm
    bp = (jnp.pad(bf, (0, Hp - H)) if Hp != H else bf).reshape(1, Hp)

    cost = pl.CostEstimate(
        flops=2 * Mp * Hp * Hp,
        transcendentals=0,
        bytes_accessed=(Mp * Hp * lhs_item        # x read once
                        + Hp * Hp * lhs_item      # W read once
                        + Hp * 4                  # bias
                        + Mp * Hp * out_item),    # output
    )

    w_bytes = Hp * Hp * lhs_item
    if w_resident == "auto":
        # Double-buffered W + x tile + output tile must fit comfortably within
        # every generation's VMEM (v7x: 64 MiB physical, 32 MiB scoped default).
        footprint = (2 * w_bytes
                     + 2 * tm * Hp * lhs_item
                     + 2 * tm * Hp * out_item
                     + 2 * Hp * 4)
        w_resident = footprint <= 24 * 1024 * 1024

    if w_resident:
        # W index_map is constant -> DMA'd once, resident across all M tiles.
        out2 = pl.pallas_call(
            _resident_kernel,
            out_shape=jax.ShapeDtypeStruct((Mp, Hp), out_dtype),
            grid=(Mp // tm,),
            in_specs=[
                pl.BlockSpec((tm, Hp), lambda i: (i, 0)),   # x: streamed once
                pl.BlockSpec((Hp, Hp), lambda i: (0, 0)),   # W: VMEM-resident
                pl.BlockSpec((1, Hp), lambda i: (0, 0)),    # bias (f32)
            ],
            out_specs=pl.BlockSpec((tm, Hp), lambda i: (i, 0)),
            compiler_params=pltpu.CompilerParams(
                dimension_semantics=("parallel",),
                # Above v5e's 16 MiB scoped default; safely under v7x's 64 MiB.
                vmem_limit_bytes=32 * 1024 * 1024),
            cost_estimate=cost,
        )(x2, wp, bp)
    else:
        grid = (Mp // tm, Hp // th, Hp // th)   # (M tiles, N tiles, K tiles)
        # k == j residual fold requires tk == tn and identical K/N padding.
        assert grid[1] == grid[2]

        in_specs = [
            pl.BlockSpec((tm, th), lambda i, j, k: (i, k)),  # x (LHS; residual @ k==j)
            pl.BlockSpec((th, th), lambda i, j, k: (k, j)),  # W
            pl.BlockSpec((1, th), lambda i, j, k: (0, j)),   # bias (f32)
        ]
        out_specs = pl.BlockSpec((tm, th), lambda i, j, k: (i, j))
        cparams = pltpu.CompilerParams(
            dimension_semantics=("parallel", "parallel", "arbitrary"))

        if out_dtype == jnp.float32:
            out2 = pl.pallas_call(
                _streaming_kernel_f32,
                out_shape=jax.ShapeDtypeStruct((Mp, Hp), out_dtype),
                grid=grid, in_specs=in_specs, out_specs=out_specs,
                compiler_params=cparams, cost_estimate=cost,
            )(x2, wp, bp)
        else:
            out2 = pl.pallas_call(
                _streaming_kernel,
                out_shape=jax.ShapeDtypeStruct((Mp, Hp), out_dtype),
                grid=grid, in_specs=in_specs, out_specs=out_specs,
                scratch_shapes=[pltpu.VMEM((tm, th), jnp.float32)],
                compiler_params=cparams, cost_estimate=cost,
            )(x2, wp, bp)

    return out2[:M, :H].reshape(B, S, H)


# --------------------------------------------------------------------------
# Self-test
# --------------------------------------------------------------------------
def _reference(x, w, b, use_bf16):
    if use_bf16:
        xf = x.astype(jnp.bfloat16).astype(jnp.float32)
        wf = w.astype(jnp.bfloat16).astype(jnp.float32)
    else:
        xf = x.astype(jnp.float32)
        wf = w.astype(jnp.float32)
    y = jnp.dot(xf, wf.reshape(wf.shape), precision=jax.lax.Precision.HIGHEST)
    return y + b.astype(jnp.float32) + xf


if __name__ == "__main__":
    key = jax.random.PRNGKey(0)
    kx, kw, kb = jax.random.split(key, 3)

    def make_inputs(B, S, H, x_dtype):
        x = jax.random.normal(kx, (B, S, H), dtype=jnp.float32).astype(x_dtype)
        w = (jax.random.normal(kw, (H, H), dtype=jnp.float32) * 0.02).astype(x_dtype)
        b = jax.random.normal(kb, (H,), dtype=jnp.float32) * 0.02
        return x, w, b

    configs = [
        # (name, B, S, H, x_dtype, kwargs, atol, rtol)
        ("resident_bf16", 2, 8, 32, jnp.float32,
         dict(), 1e-3, 1e-3),
        ("streaming_bf16_f32out", 2, 8, 256, jnp.float32,
         dict(tm_max=16, th_max=128, w_resident=False), 1e-3, 1e-3),
        ("streaming_bf16_bf16out", 2, 8, 256, jnp.bfloat16,
         dict(tm_max=16, th_max=128, w_resident=False), 5e-2, 5e-2),
        ("resident_f32_exact", 2, 8, 32, jnp.float32,
         dict(use_bf16=False), 1e-4, 1e-4),
        ("streaming_f32_exact", 2, 8, 256, jnp.float32,
         dict(use_bf16=False, tm_max=16, th_max=128, w_resident=False),
         1e-4, 1e-4),
    ]

    for name, B, S, H, x_dtype, kwargs, atol, rtol in configs:
        x, w, b = make_inputs(B, S, H, x_dtype)
        out = residual_linear(x, w, b, **kwargs)
        jax.block_until_ready(out)

        assert out.shape == x.shape, f"{name}: shape mismatch"
        assert out.dtype == x.dtype, f"{name}: dtype mismatch"

        use_bf16 = kwargs.get("use_bf16", True)
        ref = _reference(x.reshape(B * S, H), w, b, use_bf16).reshape(B, S, H)
        ok = jnp.allclose(out.astype(jnp.float32), ref, atol=atol, rtol=rtol)
        assert bool(ok), f"{name}: mismatch vs reference"

    print("KERNEL_OK")
</pallas_src>

<mosaic_0001>
module attributes {stable_mosaic.version = 11 : i64} {
  func.func @_resident_kernel(%arg0: i32, %arg1: memref<16x128xbf16, #tpu.memory_space<vmem>>, %arg2: memref<128x128xbf16, #tpu.memory_space<vmem>>, %arg3: memref<1x128xf32, #tpu.memory_space<vmem>>, %arg4: memref<16x128xf32, #tpu.memory_space<vmem>>) attributes {dimension_semantics = [#tpu.dimension_semantics<parallel>], iteration_bounds = array<i64: 1>, scalar_prefetch = 0 : i64, scratch_operands = 0 : i64, tpu.core_type = #tpu.core_type<tc>, window_params = [{transform_indices = @transform_0, window_bounds = array<i64: 16, 128>}, {pipeline_mode = #tpu.pipeline_mode<synchronous>, transform_indices = @transform_1, window_bounds = array<i64: 128, 128>}, {pipeline_mode = #tpu.pipeline_mode<synchronous>, transform_indices = @transform_2, window_bounds = array<i64: 1, 128>}, {transform_indices = @transform_3, window_bounds = array<i64: 16, 128>}]} {
    %c0 = arith.constant 0 : index
    %c0_0 = arith.constant 0 : index
    %0 = vector.load %arg1[%c0, %c0_0] : memref<16x128xbf16, #tpu.memory_space<vmem>>, vector<16x128xbf16>
    %1 = arith.extf %0 : vector<16x128xbf16> to vector<16x128xf32>
    %c0_1 = arith.constant 0 : index
    %c0_2 = arith.constant 0 : index
    %2 = vector.load %arg3[%c0_1, %c0_2] : memref<1x128xf32, #tpu.memory_space<vmem>>, vector<1x128xf32>
    %3 = vector.broadcast %2 : vector<1x128xf32> to vector<16x128xf32>
    %4 = arith.addf %1, %3 : vector<16x128xf32>
    %c0_3 = arith.constant 0 : index
    %c0_4 = arith.constant 0 : index
    %5 = vector.load %arg1[%c0_3, %c0_4] : memref<16x128xbf16, #tpu.memory_space<vmem>>, vector<16x128xbf16>
    %c0_5 = arith.constant 0 : index
    %c0_6 = arith.constant 0 : index
    %6 = vector.load %arg2[%c0_5, %c0_6] : memref<128x128xbf16, #tpu.memory_space<vmem>>, vector<128x128xbf16>
    %cst = arith.constant dense<0.000000e+00> : vector<16x128xf32>
    %7 = tpu.matmul %5, %6, %cst {dimension_numbers = #tpu.dot_dimension_numbers<[1], [0], [0], [1], [0, 0, 1, 1], [], []>} : vector<16x128xbf16>, vector<128x128xbf16>, vector<16x128xf32> -> vector<16x128xf32>
    %8 = arith.addf %4, %7 : vector<16x128xf32>
    %c0_7 = arith.constant 0 : index
    %c0_8 = arith.constant 0 : index
    %9 = vector.load %arg4[%c0_7, %c0_8] : memref<16x128xf32, #tpu.memory_space<vmem>>, vector<16x128xf32>
    tpu.vector_store %arg4[%c0_7, %c0_8], %8 {strides = array<i32>} : memref<16x128xf32, #tpu.memory_space<vmem>>, vector<16x128xf32>,
    return
  }
  func.func @transform_0(%arg0: i32) -> (i32, i32) {
    %c0_i32 = arith.constant 0 : i32
    %c0_i32_0 = arith.constant 0 : i32
    return %arg0, %c0_i32 : i32, i32
  }
  func.func @transform_1(%arg0: i32) -> (i32, i32) {
    %c0_i32 = arith.constant 0 : i32
    %c0_i32_0 = arith.constant 0 : i32
    %c0_i32_1 = arith.constant 0 : i32
    return %c0_i32, %c0_i32_0 : i32, i32
  }
  func.func @transform_2(%arg0: i32) -> (i32, i32) {
    %c0_i32 = arith.constant 0 : i32
    %c0_i32_0 = arith.constant 0 : i32
    %c0_i32_1 = arith.constant 0 : i32
    return %c0_i32, %c0_i32_0 : i32, i32
  }
  func.func @transform_3(%arg0: i32) -> (i32, i32) {
    %c0_i32 = arith.constant 0 : i32
    %c0_i32_0 = arith.constant 0 : i32
    return %arg0, %c0_i32 : i32, i32
  }
}

</mosaic_0001>

<bundles_post_ra>
// kernel: tpu_custom_call.1
= control target key start
LH: loop header
LB: loop body
LE: loop exit
PB: predicated region body
PF: predicated region fallthrough
CT: control target
= control target key end

     0   :  { %8 = vsyncpa [#allocation3], 0  ;;  %s335_s0 = inlined_call_operand.hbm [shape: bf16[16,128], index: 0, kind: input, shape index: {}]   ;;  %s336_s1 = inlined_call_operand.hbm [shape: bf16[128,128], index: 1, kind: input, shape index: {}]   ;;  %s337_s2 = inlined_call_operand.vmem [shape: f32[1,128], index: 2, kind: input, shape index: {}]   ;;  %s338_s3 = inlined_call_operand.hbm [shape: f32[16,128], index: 3, kind: output, shape index: {}]  }
   0x1   :  { %9 = vsyncpa [#allocation6], 0 }
   0x2   :  { %10 = vsyncpa [#allocation4], 0  ;;  %s15_s14 = sshll.u32 %s335_s0, 4  ;;  %s296_s15 = smov [#allocation2]   ;;  %s16_s14 = int_to_ptr.hbm [resolvable:$true] %s15_s14 }
   0x3   :  { %s17_s16 = sshll.u32 %s296_s15, 4  ;;  %s28_s19 = sshll.u32 %s336_s1, 4  ;;  %s18_s16 = int_to_ptr.vmem [resolvable:$true] %s17_s16  ;;  %s29_s19 = int_to_ptr.hbm [resolvable:$true] %s28_s19 }
   0x4   :  { %s297_s20 = smov 64   ;;  %s298_s21 = smov 4  }
   0x5   :  { %23 = dma.hbm_to_vmem [thread:$0]  %s16_s14, 128, %s18_s16, [#allocation3], %s297_s20, %s297_s20, %s298_s21  }
   0x6   :  { %s299_s22 = smov [#allocation5]  }
   0x7   :  { %s30_s23 = sshll.u32 %s299_s22, 4  ;;  %s31_s23 = int_to_ptr.vmem [resolvable:$true] %s30_s23 }
   0x8   :  { %36 = dma.hbm_to_vmem [thread:$0]  %s29_s19, 1024, %s31_s23, [#allocation6], %s297_s20, %s297_s20, %s298_s21  }
   0x9   :  { %290 = dma.done.wait [#allocation3], 128  }
   0xa   :  { %291 = vsyncadd [#allocation3], 4294967168 }
   0xb   :  { %292 = dma.done.wait [#allocation6], 1024  }
   0xc   :  { %293 = vsyncadd [#allocation6], 4294966272  ;;  %v209_v0 = vld [vmem:[#allocation5 + $0x38] sm:$0xff]  ;;  %v208_v1 = vld [vmem:[#allocation5 + $0x30] sm:$0xff]  ;;  %s300_s24 = smov [#allocation7]   ;;  %s151_s28 = sshll.u32 %s338_s3, 4  ;;  %s152_s28 = int_to_ptr.hbm [resolvable:$true] %s151_s28 }
   0xd   :  { %127 = vmatpush.bf16.msra.mxu0 %v209_v0  ;;  %v207_v2 = vld [vmem:[#allocation5 + $0x28] sm:$0xff]  ;;  %v206_v3 = vld [vmem:[#allocation5 + $0x20] sm:$0xff]  ;;  %v205_v4 = vld [vmem:[#allocation5 + $0x18] sm:$0xff]  ;;  %s149_s25 = sshll.u32 %s300_s24, 4  ;;  %s301_s29 = smov 128   ;;  %s150_s25 = int_to_ptr.vmem [resolvable:$true] %s149_s25 }
   0xe   :  { %v204_v5 = vld [vmem:[#allocation5 + $0x10] sm:$0xff]  ;;  %v203_v6 = vld [vmem:[#allocation5 + $0x8] sm:$0xff]  ;;  %v202_v7 = vld [vmem:[#allocation5] sm:$0xff]  ;;  %s302_s30 = smov 8  }
   0xf   :  { %v201_v8 = vld [vmem:[#allocation2] sm:$0xff] }
  0x10   :  { %v47_v9 = vld [vmem:[#allocation2] sm:$0xff]  }
  0x11   :  { %128 = vmatpush.bf16.msra.mxu0 %v208_v1  ;;  %v49_v10 = vunpack.c.l.bf16 %v47_v9  ;;  %v217_v11 = vld [vmem:[%s337_s2] ss:$0 sm:$0xff]  ;;  %v50_v15 = vunpack.c.h.bf16 %v47_v9 }
  0x13   :  { %v55_v12 = vadd.f32 %v217_v11, %v49_v10  ;;  %v56_v16 = vadd.f32 %v217_v11, %v50_v15 }
  0x15   :  { %129 = vmatpush.bf16.msra.mxu0 %v207_v2 }
  0x19   :  { %130 = vmatpush.bf16.msra.mxu0 %v206_v3 }
  0x1d   :  { %131 = vmatpush.bf16.msra.mxu0 %v205_v4 }
  0x21   :  { %132 = vmatpush.bf16.msra.mxu0 %v204_v5 }
  0x25   :  { %133 = vmatpush.bf16.msra.mxu0 %v203_v6 }
  0x29   :  { %134 = vmatpush.bf16.msra.mxu0 %v202_v7 }
  0x2c   :  { %135 = vmatmul.bf16.vlgmr.msra.gmra.mxu0 %v201_v8 }
  0xa9   :  { %v136_v13 = vpop.f32.mrf.mxu0 }
  0xaa   :  { %v141_v14 = vadd.f32 %v136_v13, %v55_v12 }
  0xac   :  { %143 = vst [vmem:[#allocation7] sm:$0xff] %v141_v14 }
  0xb1   :  { %v138_v17 = vpop.f32.mrf.mxu0 }
  0xb2   :  { %v142_v18 = vadd.f32 %v138_v17, %v56_v16 }
  0xb4   :  { %144 = vst [vmem:[#allocation7 + $0x8] sm:$0xff] %v142_v18 }
  0xb5   :  { %157 = dma.vmem_to_hbm [thread:$0]  %s150_s25, 256, %s152_s28, [#allocation4], %s301_s29, %s301_s29, %s302_s30  }
  0xb6   :  { %294 = dma.done.wait [#allocation4], 256  }
  0xb7   :  { %295 = vsyncadd [#allocation4], 4294967040 }
  0xb8   :  { %162 = vsyncpa [#allocation3], 1 }
  0xb9   :  { %163 = vsyncpa [#allocation6], 1 }
  0xba   :  { %164 = vsyncpa [#allocation4], 1 }

</bundles_post_ra>
